<compile_context>
chip_gen: v6e
topology: v6e:2x2x1
jax: 0.10.0
libtpu: 0.0.40
codegen_flags: <defaults>
</compile_context>

<pallas_src>
import jax
import jax.numpy as jnp
from jax.experimental import pallas as pl
from jax.experimental.pallas import tpu as pltpu


def _head_attention_kernel(w_ref, toks_ref, mask_ref, out_ref):
    # w_ref:    (1, H)       projection weight as a lane-dense row
    # toks_ref: (TB, S, H)   TB batch rows per grid step
    # mask_ref: (TB, S, 1)   float mask (0/1); column layout so the softmax
    #                        reduction runs along the sublane axis per row
    # out_ref:  (TB, 1, H)   pooled output rows
    toks = toks_ref[...]                       # (TB, S, H)
    w_row = w_ref[...]                         # (1, H)
    mask = mask_ref[...]                       # (TB, S, 1)

    # Linear(H -> 1) without bias: lane-dense multiply + lane reduce.
    # (An (S,H)@(H,1) MXU matmul would use <1% of the MXU; this VPU/XLU form
    #  hides under the toks DMA.  Bias is dropped: softmax(x + c) == softmax(x).)
    scores = jnp.sum(toks * w_row, axis=-1, keepdims=True)        # (TB, S, 1)

    # Masked softmax over the sequence axis (axis=1 here == dim=-1 in torch),
    # with masked_softmax's two normalizations fused into one divide:
    # exp(-inf) == 0 at masked slots, so dividing e*mask once by
    # sum(e*mask) + 1e-13 reproduces softmax(masked)*mask renormalized.
    masked = jnp.where(mask > 0, scores, -jnp.inf)
    mx = jnp.max(masked, axis=1, keepdims=True)                   # (TB, 1, 1)
    e = jnp.exp(masked - mx)                                      # (TB, S, 1)
    num = e * mask
    inv = 1.0 / (jnp.sum(num, axis=1, keepdims=True) + 1e-13)     # (TB, 1, 1)
    w_att = num * inv                                             # (TB, S, 1)

    # Weighted sum over the sequence: (TB,S,1)*(TB,S,H) summed over S.
    out_ref[...] = jnp.sum(w_att * toks, axis=1, keepdims=True)   # (TB, 1, H)


def _choose_batch_tile(B, S, H, target_block_bytes):
    """Largest batch tile whose f32 toks block stays under target_block_bytes."""
    row_bytes = S * H * 4
    return int(max(1, min(B, target_block_bytes // max(row_bytes, 1))))


def head_attention(toks, mask, weight, bias=None, *,
                   target_block_bytes=8 * 1024 * 1024,
                   vmem_limit_bytes=40 * 1024 * 1024):
    """toks: (B, S, H); mask: (B, S) bool/float; weight: Linear(H, 1) weight in
    shape (H, 1), (1, H) or (H,).  bias is accepted for interface parity but is
    mathematically a no-op under the softmax and is not sent to the kernel."""
    B, S, H = toks.shape
    del bias  # softmax(x + c) == softmax(x): the Linear bias cannot change the output

    toks_f = toks.astype(jnp.float32)
    mask_f = mask.astype(jnp.float32).reshape(B, S)
    w_row = jnp.reshape(weight, (1, H)).astype(jnp.float32)

    tb = _choose_batch_tile(B, S, H, target_block_bytes)
    pad = (-B) % tb
    if pad:
        toks_f = jnp.pad(toks_f, ((0, pad), (0, 0), (0, 0)))
        # Pad the mask with ones so padded rows stay finite (they are sliced off).
        mask_f = jnp.pad(mask_f, ((0, pad), (0, 0)), constant_values=1.0)
    bp = B + pad
    mask_col = mask_f.reshape(bp, S, 1)

    out = pl.pallas_call(
        _head_attention_kernel,
        out_shape=jax.ShapeDtypeStruct((bp, 1, H), jnp.float32),
        grid_spec=pltpu.PrefetchScalarGridSpec(
            num_scalar_prefetch=0,
            grid=(bp // tb,),
            in_specs=[
                pl.BlockSpec((1, H), lambda b: (0, 0)),          # weight row (shared)
                pl.BlockSpec((tb, S, H), lambda b: (b, 0, 0)),   # toks batch tile
                pl.BlockSpec((tb, S, 1), lambda b: (b, 0, 0)),   # mask batch tile
            ],
            out_specs=pl.BlockSpec((tb, 1, H), lambda b: (b, 0, 0)),
        ),
        compiler_params=pltpu.CompilerParams(
            dimension_semantics=("parallel",),
            vmem_limit_bytes=vmem_limit_bytes,
        ),
    )(w_row, toks_f, mask_col)

    out = out.reshape(bp, H)
    return out[:B] if pad else out


def _reference(toks, mask, weight, bias):
    # Pure-JAX replica of the PyTorch forward (including the bias), for verification.
    scores = jnp.einsum("bsh,ho->bso", toks, weight)[..., 0] + bias[0, 0]  # (B, S)
    mask_f = mask.astype(jnp.float32)
    masked = jnp.where(mask_f > 0, scores, -jnp.inf)
    soft = jax.nn.softmax(masked, axis=-1) * mask_f
    weights = soft / (soft.sum(axis=-1, keepdims=True) + 1e-13)
    return (weights[..., None] * toks).sum(axis=1)


if __name__ == "__main__":
    key = jax.random.PRNGKey(0)
    k_tok, k_w, k_b, k_tok2 = jax.random.split(key, 4)

    # Case 1: the module's natural small shapes (B=2, S=8, H=32).
    B, S, H = 2, 8, 32
    toks = jax.random.normal(k_tok, (B, S, H), dtype=jnp.float32)
    lengths = jnp.array([[8], [5]], dtype=jnp.int32)
    mask = (jnp.arange(S)[None, :] < lengths).astype(jnp.float32)     # (B, S)
    weight = jax.random.normal(k_w, (H, 1), dtype=jnp.float32) * 0.1  # Linear(H, 1) weight
    bias = jax.random.normal(k_b, (1, 1), dtype=jnp.float32) * 0.1

    out = jax.block_until_ready(head_attention(toks, mask, weight, bias))
    ref = _reference(toks, mask, weight, bias)
    if not jnp.allclose(out, ref, atol=1e-5, rtol=1e-5):
        raise AssertionError(f"case1 mismatch: max abs err {jnp.max(jnp.abs(out - ref))}")

    # Case 2: exercises the batch-tiling + padding path (B=5 with a forced tiny
    # block budget -> TB=2, padded batch of 6, grid of 3 steps).
    B2 = 5
    toks2 = jax.random.normal(k_tok2, (B2, S, H), dtype=jnp.float32)
    lengths2 = jnp.array([[8], [5], [3], [8], [1]], dtype=jnp.int32)
    mask2 = (jnp.arange(S)[None, :] < lengths2).astype(jnp.float32)
    out2 = jax.block_until_ready(
        head_attention(toks2, mask2, weight, bias, target_block_bytes=2 * S * H * 4))
    ref2 = _reference(toks2, mask2, weight, bias)
    if not jnp.allclose(out2, ref2, atol=1e-5, rtol=1e-5):
        raise AssertionError(f"case2 mismatch: max abs err {jnp.max(jnp.abs(out2 - ref2))}")

    print("KERNEL_OK")
</pallas_src>

<mosaic_0001>
module attributes {stable_mosaic.version = 11 : i64} {
  func.func @_head_attention_kernel(%arg0: i32, %arg1: memref<1x32xf32, #tpu.memory_space<vmem>>, %arg2: memref<2x8x32xf32, #tpu.memory_space<vmem>>, %arg3: memref<2x8x1xf32, #tpu.memory_space<vmem>>, %arg4: memref<2x1x32xf32, #tpu.memory_space<vmem>>) attributes {dimension_semantics = [#tpu.dimension_semantics<parallel>], iteration_bounds = array<i64: 1>, scalar_prefetch = 0 : i64, scratch_operands = 0 : i64, tpu.core_type = #tpu.core_type<tc>, window_params = [{pipeline_mode = #tpu.pipeline_mode<synchronous>, transform_indices = @transform_0, window_bounds = array<i64: 1, 32>}, {transform_indices = @transform_1, window_bounds = array<i64: 2, 8, 32>}, {transform_indices = @transform_2, window_bounds = array<i64: 2, 8, 1>}, {transform_indices = @transform_3, window_bounds = array<i64: 2, 1, 32>}]} {
    %c0 = arith.constant 0 : index
    %c0_0 = arith.constant 0 : index
    %c0_1 = arith.constant 0 : index
    %0 = vector.load %arg2[%c0, %c0_0, %c0_1] : memref<2x8x32xf32, #tpu.memory_space<vmem>>, vector<2x8x32xf32>
    %c0_2 = arith.constant 0 : index
    %c0_3 = arith.constant 0 : index
    %1 = vector.load %arg1[%c0_2, %c0_3] : memref<1x32xf32, #tpu.memory_space<vmem>>, vector<1x32xf32>
    %c0_4 = arith.constant 0 : index
    %c0_5 = arith.constant 0 : index
    %c0_6 = arith.constant 0 : index
    %2 = vector.load %arg3[%c0_4, %c0_5, %c0_6] : memref<2x8x1xf32, #tpu.memory_space<vmem>>, vector<2x8x1xf32>
    %3 = vector.shape_cast %1 : vector<1x32xf32> to vector<1x1x32xf32>
    %4 = vector.broadcast %3 : vector<1x1x32xf32> to vector<2x8x32xf32>
    %5 = arith.mulf %0, %4 : vector<2x8x32xf32>
    %cst = arith.constant dense<0.000000e+00> : vector<2x8xf32>
    %6 = vector.multi_reduction <add>, %5, %cst [2] : vector<2x8x32xf32> to vector<2x8xf32>
    %7 = vector.shape_cast %6 : vector<2x8xf32> to vector<2x8x1xf32>
    %cst_7 = arith.constant 0.000000e+00 : f32
    %8 = vector.broadcast %cst_7 : f32 to vector<2x8x1xf32>
    %9 = arith.cmpf ogt, %2, %8 : vector<2x8x1xf32>
    %cst_8 = arith.constant 0xFF800000 : f32
    %10 = vector.broadcast %cst_8 : f32 to vector<2x8x1xf32>
    %11 = arith.select %9, %7, %10 : vector<2x8x1xi1>, vector<2x8x1xf32>
    %cst_9 = arith.constant dense<0xFF800000> : vector<2x1xf32>
    %12 = vector.multi_reduction <maximumf>, %11, %cst_9 [1] : vector<2x8x1xf32> to vector<2x1xf32>
    %13 = vector.shape_cast %12 : vector<2x1xf32> to vector<2x1x1xf32>
    %14 = vector.broadcast %13 : vector<2x1x1xf32> to vector<2x8x1xf32>
    %15 = arith.subf %11, %14 : vector<2x8x1xf32>
    %16 = math.exp %15 : vector<2x8x1xf32>
    %17 = arith.mulf %16, %2 : vector<2x8x1xf32>
    %cst_10 = arith.constant dense<0.000000e+00> : vector<2x1xf32>
    %18 = vector.multi_reduction <add>, %17, %cst_10 [1] : vector<2x8x1xf32> to vector<2x1xf32>
    %19 = vector.shape_cast %18 : vector<2x1xf32> to vector<2x1x1xf32>
    %cst_11 = arith.constant 9.99999982E-14 : f32
    %20 = vector.broadcast %cst_11 : f32 to vector<2x1x1xf32>
    %21 = arith.addf %19, %20 : vector<2x1x1xf32>
    %cst_12 = arith.constant 1.000000e+00 : f32
    %22 = vector.broadcast %cst_12 : f32 to vector<2x1x1xf32>
    %23 = arith.divf %22, %21 : vector<2x1x1xf32>
    %24 = vector.broadcast %23 : vector<2x1x1xf32> to vector<2x8x1xf32>
    %25 = arith.mulf %17, %24 : vector<2x8x1xf32>
    %26 = vector.broadcast %25 : vector<2x8x1xf32> to vector<2x8x32xf32>
    %27 = arith.mulf %26, %0 : vector<2x8x32xf32>
    %cst_13 = arith.constant dense<0.000000e+00> : vector<2x32xf32>
    %28 = vector.multi_reduction <add>, %27, %cst_13 [1] : vector<2x8x32xf32> to vector<2x32xf32>
    %29 = vector.shape_cast %28 : vector<2x32xf32> to vector<2x1x32xf32>
    %c0_14 = arith.constant 0 : index
    %c0_15 = arith.constant 0 : index
    %c0_16 = arith.constant 0 : index
    %30 = vector.load %arg4[%c0_14, %c0_15, %c0_16] : memref<2x1x32xf32, #tpu.memory_space<vmem>>, vector<2x1x32xf32>
    tpu.vector_store %arg4[%c0_14, %c0_15, %c0_16], %29 {strides = array<i32>} : memref<2x1x32xf32, #tpu.memory_space<vmem>>, vector<2x1x32xf32>,
    return
  }
  func.func @transform_0(%arg0: i32) -> (i32, i32) {
    %c0_i32 = arith.constant 0 : i32
    %c0_i32_0 = arith.constant 0 : i32
    %c0_i32_1 = arith.constant 0 : i32
    return %c0_i32, %c0_i32_0 : i32, i32
  }
  func.func @transform_1(%arg0: i32) -> (i32, i32, i32) {
    %c0_i32 = arith.constant 0 : i32
    %c0_i32_0 = arith.constant 0 : i32
    %c0_i32_1 = arith.constant 0 : i32
    return %arg0, %c0_i32, %c0_i32_0 : i32, i32, i32
  }
  func.func @transform_2(%arg0: i32) -> (i32, i32, i32) {
    %c0_i32 = arith.constant 0 : i32
    %c0_i32_0 = arith.constant 0 : i32
    %c0_i32_1 = arith.constant 0 : i32
    return %arg0, %c0_i32, %c0_i32_0 : i32, i32, i32
  }
  func.func @transform_3(%arg0: i32) -> (i32, i32, i32) {
    %c0_i32 = arith.constant 0 : i32
    %c0_i32_0 = arith.constant 0 : i32
    %c0_i32_1 = arith.constant 0 : i32
    return %arg0, %c0_i32, %c0_i32_0 : i32, i32, i32
  }
}

</mosaic_0001>

<bundles_post_ra>
// kernel: tpu_custom_call.1
= control target key start
LH: loop header
LB: loop body
LE: loop exit
PB: predicated region body
PF: predicated region fallthrough
CT: control target
= control target key end

     0   :  { %vm28_vm0 = vcmask 261120   ;;  %s224_s0 = inlined_call_operand.vmem [shape: f32[1,32], index: 0, kind: input, shape index: {}]   ;;  %s225_s1 = inlined_call_operand.vmem [shape: f32[2,8,32], index: 1, kind: input, shape index: {}]   ;;  %s226_s2 = inlined_call_operand.vmem [shape: f32[2,8,1], index: 2, kind: input, shape index: {}]   ;;  %s227_s3 = inlined_call_operand.hbm [shape: f32[2,1,32], index: 3, kind: output, shape index: {}]  }
   0x1   :  { %v193_v0 = vld [vmem:[%s225_s1] sm:$0xff]  ;;  %v201_v2 = vld [vmem:[%s225_s1 + $0x8] sm:$0xff] }
   0x2   :  { %v129_v1 = vld [vmem:[%s224_s0] ss:$0 sm:$0xff] }
   0x3   :  { %v26_v3 = vmul.f32 %v129_v1, %v193_v0  ;;  %v27_v4 = vmul.f32 %v129_v1, %v201_v2 }
   0x4   :  { %8 = vsyncpa [#allocation3], 0  ;;  %v166_v7 = vmov 0   ;;  %v18_v8 = vld [vmem:[%s226_s2] sm:$0xff]  ;;  %vm39_vm2 = vcmask 7168   ;;  %v19_v9 = vld [vmem:[%s226_s2 + $0x8] sm:$0xff] }
   0x5   :  { %v29_v5 = vsel %vm28_vm0, %v26_v3, 0.0  ;;  %v32_v6 = vsel %vm28_vm0, %v27_v4, 0.0  ;;  %134 = vset.pattern.permute.xlu1 %v166_v7  ;;  %135 = vset.pattern.permute.xlu0 %v166_v7  ;;  %vm35_vm1 = vcmp.gt.f32.partialorder %v18_v8, 0.0  ;;  %vm36_vm3 = vcmp.gt.f32.partialorder %v19_v9, 0.0  ;;  %s167_s2 = smov [#allocation2]  }
   0x6   :  { %30 = vadd.xlane.f32.xlu0 %v29_v5  ;;  %vm110_vm4 = vcmask 253952   ;;  %s118_s20 = sshll.u32 %s167_s2, 4  ;;  %s119_s20 = int_to_ptr.vmem [resolvable:$true] %s118_s20 }
   0x7   :  { %s144_s21 = scalar_lea.vmem %s119_s20, 32  ;;  %p149_p1 = scmp.lt.s32.totalorder %s119_s20, %s119_s20 }
   0x8   :  { %p145_p0 = scmp.ne.s32.totalorder %s119_s20, %s144_s21  ;;  %p150_p2 = scmp.lt.s32.totalorder %s144_s21, %s144_s21 }
   0xa   :  { %33 = vadd.xlane.f32.xlu0 %v32_v6  ;;  %p151_p3 = por %p150_p2, %p149_p1 }
   0xc   :  { %p152_p4 = pnand %p151_p3, %p145_p0 }
  0x8f   :  { %v31_v10 = vpop.xlane.xlu0 %30 }
  0x90   :  { %v37_v11 = vsel %vm35_vm1, %v31_v10, -inf }
  0x91   :  { %v40_v12 = vsel %vm39_vm2, %v37_v11, -inf }
  0x92   :  { %v41_v13 = vrot.slane %v40_v12, 4 }
  0x93   :  { %v34_v14 = vpop.xlane.xlu0 %33 }
  0x94   :  { %v42_v15 = vmax.f32 %v40_v12, %v41_v13  ;;  %v38_v16 = vsel %vm36_vm3, %v34_v14, -inf }
  0x95   :  { %v47_v17 = vsel %vm39_vm2, %v38_v16, -inf }
  0x96   :  { %v43_v18 = vrot.slane %v42_v15, 2  ;;  %v48_v19 = vrot.slane %v47_v17, 4 }
  0x98   :  { %v44_v20 = vmax.f32 %v42_v15, %v43_v18  ;;  %v49_v21 = vmax.f32 %v47_v17, %v48_v19 }
  0x9a   :  { %v45_v22 = vrot.slane %v44_v20, 1  ;;  %v50_v23 = vrot.slane %v49_v21, 2 }
  0x9c   :  { %v46_v24 = vmax.f32 %v44_v20, %v45_v22  ;;  %v51_v25 = vmax.f32 %v49_v21, %v50_v23 }
  0x9e   :  { %v54_v26 = vsub.f32 %v37_v11, %v46_v24  ;;  %v52_v27 = vrot.slane %v51_v25, 1 }
  0xa0   :  { %v56_v28 = vmul.f32 1.442695, %v54_v26  ;;  %v53_v29 = vmax.f32 %v51_v25, %v52_v27 }
  0xa2   :  { %136 = vpow2.f32 %v56_v28  ;;  %v55_v30 = vsub.f32 %v38_v16, %v53_v29 }
  0xa4   :  { %v58_v31 = vmul.f32 1.442695, %v55_v30 }
  0xa6   :  { %138 = vpow2.f32 %v58_v31 }
  0xaf   :  { %v137_v32 = vpop.eup %136 }
  0xb0   :  { %v60_v33 = vmul.f32 %v137_v32, %v18_v8 }
  0xb2   :  { %v62_v34 = vsel %vm39_vm2, %v60_v33, 0.0 }
  0xb3   :  { %v139_v35 = vpop.eup %138  ;;  %v63_v36 = vrot.slane %v62_v34, 4 }
  0xb4   :  { %v61_v37 = vmul.f32 %v139_v35, %v19_v9 }
  0xb5   :  { %v64_v38 = vadd.f32 %v63_v36, %v62_v34 }
  0xb6   :  { %v69_v39 = vsel %vm39_vm2, %v61_v37, 0.0 }
  0xb7   :  { %v70_v40 = vrot.slane %v69_v39, 4  ;;  %v65_v41 = vrot.slane %v64_v38, 2 }
  0xb9   :  { %v71_v42 = vadd.f32 %v70_v40, %v69_v39  ;;  %v66_v43 = vadd.f32 %v65_v41, %v64_v38 }
  0xbb   :  { %v72_v44 = vrot.slane %v71_v42, 2  ;;  %v67_v45 = vrot.slane %v66_v43, 1 }
  0xbd   :  { %v73_v46 = vadd.f32 %v72_v44, %v71_v42  ;;  %v68_v47 = vadd.f32 %v67_v45, %v66_v43 }
  0xbf   :  { %v74_v48 = vrot.slane %v73_v46, 1  ;;  %v76_v49 = vadd.f32 1e-13, %v68_v47 }
  0xc1   :  { %v75_v50 = vadd.f32 %v74_v48, %v73_v46  ;;  %140 = vrcp.f32 %v76_v49 }
  0xc3   :  { %v77_v51 = vadd.f32 1e-13, %v75_v50 }
  0xc5   :  { %142 = vrcp.f32 %v77_v51 }
  0xce   :  { %v141_v52 = vpop.eup %140 }
  0xcf   :  { %v82_v53 = vmul.f32 %v141_v52, %v60_v33 }
  0xd1   :  { %86 = vperm.xlu1 %134, %v82_v53  }
  0xd2   :  { %v143_v54 = vpop.eup %142 }
  0xd3   :  { %v83_v55 = vmul.f32 %v143_v54, %v61_v37 }
  0xd5   :  { %91 = vperm.xlu1 %134, %v83_v55  }
 0x14c   :  { %v87_v56 = vpop.permute.xlu1 %86 }
 0x14d   :  { %v94_v57 = vmul.f32 %v87_v56, %v193_v0 }
 0x14f   :  { %v96_v58 = vsel %vm28_vm0, %v94_v57, 0.0 }
 0x150   :  { %v97_v59 = vrot.slane %v96_v58, 4  ;;  %v92_v60 = vpop.permute.xlu1 %91 }
 0x151   :  { %v95_v61 = vmul.f32 %v92_v60, %v201_v2 }
 0x152   :  { %v98_v62 = vadd.f32 %v97_v59, %v96_v58 }
 0x153   :  { %v103_v63 = vsel %vm28_vm0, %v95_v61, 0.0 }
 0x154   :  { %v99_v1 = vrot.slane %v98_v62, 2  ;;  %v104_v3 = vrot.slane %v103_v63, 4 }
 0x156   :  { %v100_v4 = vadd.f32 %v99_v1, %v98_v62  ;;  %v105_v5 = vadd.f32 %v104_v3, %v103_v63 }
 0x158   :  { %v101_v6 = vrot.slane %v100_v4, 1  ;;  %v106_v7 = vrot.slane %v105_v5, 2 }
 0x15a   :  { %v102_v8 = vadd.f32 %v101_v6, %v100_v4  ;;  %v107_v9 = vadd.f32 %v106_v7, %v105_v5 }
 0x15c   :  { %v108_v0 = vrot.slane %v107_v9, 1  ;;  %111 = vst.msk [vmem:[#allocation2] sm:$0x1] %vm110_vm4, %v102_v8 }
 0x15e   :  { %v109_v10 = vadd.f32 %v108_v0, %v107_v9 }
 0x160   :  { %112 = vst.msk [vmem:[#allocation2 + $0x1] sm:$0x1] %vm110_vm4, %v109_v10 }
 0x161   :  { %155 = shalt.err (!%p152_p4)
}
 0x162   :  { %s168_s22 = smov 16   ;;  %s169_s23 = smov 1  }
 0x163   :  { %124 = dma.vmem_to_hbm [thread:$0]  %s119_s20, 32, %s227_s3, [#allocation3], %s168_s22, %s168_s22, %s169_s23  }
 0x164   :  { %164 = dma.done.wait [#allocation3], 32  }
 0x165   :  { %165 = vsyncadd [#allocation3], 4294967264 }
 0x166   :  { %128 = vsyncpa [#allocation3], 1 }

</bundles_post_ra>
